<compile_context>
chip_gen: v6e
topology: v6e:2x2x1
jax: 0.10.0
libtpu: 0.0.40
codegen_flags: <defaults>
</compile_context>

<pallas_src>
import jax
import jax.numpy as jnp
from jax import lax
from jax.experimental import pallas as pl
from jax.experimental.pallas import tpu as pltpu


def _linear_kernel(x_ref, w_ref, b_ref, o_ref):
    # x_ref: (tm, K)   w_ref: (N, K)  (PyTorch layout; contract on dim 1)
    # b_ref: (1, N)    o_ref: (tm, N)
    acc = lax.dot_general(
        x_ref[...], w_ref[...],
        dimension_numbers=(((1,), (1,)), ((), ())),   # x @ w.T
        preferred_element_type=jnp.float32,
    )
    o_ref[...] = (acc + b_ref[...].astype(jnp.float32)).astype(o_ref.dtype)


def embedding_to_patch(embeddings, weight, bias, *, max_tm=256):
    """Y = embeddings @ weight.T + bias.

    embeddings: (..., K); weight: (N, K) PyTorch layout; bias: (N,).
    """
    orig_shape = embeddings.shape
    K = orig_shape[-1]
    N = weight.shape[0]
    x = embeddings.reshape(-1, K)            # (M, K)
    M = x.shape[0]
    b2 = bias.reshape(1, N)                  # (1, N)

    if M <= max_tm:
        # Small problem: collapse the grid — the whole matmul is one block.
        tm = M
        m_pad = M
    else:
        # Large problem: 256-row tiles; pad M so the grid divides evenly.
        tm = max_tm
        m_pad = pl.cdiv(M, tm) * tm
        if m_pad != M:
            x = jnp.pad(x, ((0, m_pad - M), (0, 0)))

    grid_m = m_pad // tm
    itemsize = jnp.dtype(x.dtype).itemsize

    cost = pl.CostEstimate(
        flops=2 * m_pad * N * K,
        transcendentals=0,
        bytes_accessed=(m_pad * K + N * K + N + m_pad * N) * itemsize,
    )

    out = pl.pallas_call(
        _linear_kernel,
        out_shape=jax.ShapeDtypeStruct((m_pad, N), embeddings.dtype),
        grid_spec=pltpu.PrefetchScalarGridSpec(
            num_scalar_prefetch=0,
            grid=(grid_m,),
            in_specs=[
                pl.BlockSpec((tm, K), lambda i: (i, 0)),
                # Weight and bias: full arrays, constant block index
                # -> VMEM-resident, fetched from HBM exactly once.
                pl.BlockSpec((N, K), lambda i: (0, 0)),
                pl.BlockSpec((1, N), lambda i: (0, 0)),
            ],
            out_specs=pl.BlockSpec((tm, N), lambda i: (i, 0)),
        ),
        compiler_params=pltpu.CompilerParams(
            dimension_semantics=("parallel",)),
        cost_estimate=cost,
    )(x, weight, b2)

    if m_pad != M:
        out = out[:M]
    return out.reshape(*orig_shape[:-1], N)


if __name__ == "__main__":
    # Module hyperparameters (small, consistent with the forward pass):
    embed_dim = 32
    out_channel = 1
    kernel = 16
    stride = 16
    out_features = kernel * stride * out_channel   # 256

    # Example input: (batch=2, seq=8, embed_dim=32)
    key = jax.random.PRNGKey(0)
    k_x, k_w, k_b = jax.random.split(key, 3)
    embeddings = jax.random.normal(k_x, (2, 8, embed_dim), dtype=jnp.float32)

    # Deterministic parameter init (PyTorch Linear-style uniform bound).
    bound = 1.0 / (embed_dim ** 0.5)
    weight = jax.random.uniform(k_w, (out_features, embed_dim),
                                minval=-bound, maxval=bound, dtype=jnp.float32)
    bias = jax.random.uniform(k_b, (out_features,),
                              minval=-bound, maxval=bound, dtype=jnp.float32)

    result = embedding_to_patch(embeddings, weight, bias)
    result = jax.block_until_ready(result)

    # Reference check against plain-JAX linear.
    ref = embeddings @ weight.T + bias
    assert result.shape == (2, 8, out_features)
    assert jnp.allclose(result, ref, atol=1e-5, rtol=1e-5)

    print("KERNEL_OK")
</pallas_src>

<mosaic_0001>
module attributes {stable_mosaic.version = 11 : i64} {
  func.func @_linear_kernel(%arg0: i32, %arg1: memref<16x32xf32, #tpu.memory_space<vmem>>, %arg2: memref<256x32xf32, #tpu.memory_space<vmem>>, %arg3: memref<1x256xf32, #tpu.memory_space<vmem>>, %arg4: memref<16x256xf32, #tpu.memory_space<vmem>>) attributes {dimension_semantics = [#tpu.dimension_semantics<parallel>], iteration_bounds = array<i64: 1>, scalar_prefetch = 0 : i64, scratch_operands = 0 : i64, tpu.core_type = #tpu.core_type<tc>, window_params = [{transform_indices = @transform_0, window_bounds = array<i64: 16, 32>}, {pipeline_mode = #tpu.pipeline_mode<synchronous>, transform_indices = @transform_1, window_bounds = array<i64: 256, 32>}, {pipeline_mode = #tpu.pipeline_mode<synchronous>, transform_indices = @transform_2, window_bounds = array<i64: 1, 256>}, {transform_indices = @transform_3, window_bounds = array<i64: 16, 256>}]} {
    %c0 = arith.constant 0 : index
    %c0_0 = arith.constant 0 : index
    %0 = vector.load %arg1[%c0, %c0_0] : memref<16x32xf32, #tpu.memory_space<vmem>>, vector<16x32xf32>
    %c0_1 = arith.constant 0 : index
    %c0_2 = arith.constant 0 : index
    %1 = vector.load %arg2[%c0_1, %c0_2] : memref<256x32xf32, #tpu.memory_space<vmem>>, vector<256x32xf32>
    %cst = arith.constant dense<0.000000e+00> : vector<16x256xf32>
    %2 = tpu.matmul %0, %1, %cst {dimension_numbers = #tpu.dot_dimension_numbers<[1], [1], [0], [0], [0, 0, 1, 0], [], []>} : vector<16x32xf32>, vector<256x32xf32>, vector<16x256xf32> -> vector<16x256xf32>
    %c0_3 = arith.constant 0 : index
    %c0_4 = arith.constant 0 : index
    %3 = vector.load %arg3[%c0_3, %c0_4] : memref<1x256xf32, #tpu.memory_space<vmem>>, vector<1x256xf32>
    %4 = vector.broadcast %3 : vector<1x256xf32> to vector<16x256xf32>
    %5 = arith.addf %2, %4 : vector<16x256xf32>
    %c0_5 = arith.constant 0 : index
    %c0_6 = arith.constant 0 : index
    %6 = vector.load %arg4[%c0_5, %c0_6] : memref<16x256xf32, #tpu.memory_space<vmem>>, vector<16x256xf32>
    tpu.vector_store %arg4[%c0_5, %c0_6], %5 {strides = array<i32>} : memref<16x256xf32, #tpu.memory_space<vmem>>, vector<16x256xf32>,
    return
  }
  func.func @transform_0(%arg0: i32) -> (i32, i32) {
    %c0_i32 = arith.constant 0 : i32
    %c0_i32_0 = arith.constant 0 : i32
    return %arg0, %c0_i32 : i32, i32
  }
  func.func @transform_1(%arg0: i32) -> (i32, i32) {
    %c0_i32 = arith.constant 0 : i32
    %c0_i32_0 = arith.constant 0 : i32
    %c0_i32_1 = arith.constant 0 : i32
    return %c0_i32, %c0_i32_0 : i32, i32
  }
  func.func @transform_2(%arg0: i32) -> (i32, i32) {
    %c0_i32 = arith.constant 0 : i32
    %c0_i32_0 = arith.constant 0 : i32
    %c0_i32_1 = arith.constant 0 : i32
    return %c0_i32, %c0_i32_0 : i32, i32
  }
  func.func @transform_3(%arg0: i32) -> (i32, i32) {
    %c0_i32 = arith.constant 0 : i32
    %c0_i32_0 = arith.constant 0 : i32
    return %arg0, %c0_i32 : i32, i32
  }
}

</mosaic_0001>

<bundles_post_ra>
// kernel: tpu_custom_call.1
= control target key start
LH: loop header
LB: loop body
LE: loop exit
PB: predicated region body
PF: predicated region fallthrough
CT: control target
= control target key end

     0   :  { %vm61_vm0 = vcmask 261120   ;;  %s595_s0 = inlined_call_operand.vmem [shape: f32[16,32], index: 0, kind: input, shape index: {}]   ;;  %s596_s1 = inlined_call_operand.vmem [shape: f32[256,32], index: 1, kind: input, shape index: {}]   ;;  %s597_s2 = inlined_call_operand.vmem [shape: f32[1,256], index: 2, kind: input, shape index: {}]   ;;  %s598_s3 = inlined_call_operand.hbm [shape: f32[16,256], index: 3, kind: output, shape index: {}]  }
   0x1   :  { %v48_v0 = vld [vmem:[%s596_s1 + $0xf8] sm:$0xff]  ;;  %v47_v2 = vld [vmem:[%s596_s1 + $0xf0] sm:$0xff]  ;;  %v46_v4 = vld [vmem:[%s596_s1 + $0xe8] sm:$0xff] }
   0x2   :  { %v32_v1 = vld [vmem:[%s596_s1 + $0x78] sm:$0xff]  ;;  %295 = vmatprep.subr.msk.mxu0 %vm61_vm0, %v48_v0  ;;  %331 = vmatprep.subr.msk.mxu1 %vm61_vm0, %v48_v0  ;;  %v31_v3 = vld [vmem:[%s596_s1 + $0x70] sm:$0xff]  ;;  %v30_v5 = vld [vmem:[%s596_s1 + $0x68] sm:$0xff] }
   0x3   :  { %296 = vmatpush3.xpose.msk.msra.mxu0 %vm61_vm0, %v32_v1  ;;  %347 = vmatpush3.xpose.msk.msra.mxu1 %vm61_vm0, %v32_v1  ;;  %v45_v6 = vld [vmem:[%s596_s1 + $0xe0] sm:$0xff]  ;;  %v457_v9 = vld [vmem:[%s595_s0 + $0x8] sm:$0xff] }
   0x4   :  { %297 = vmatprep.subr.msk.mxu0 %vm61_vm0, %v47_v2  ;;  %332 = vmatprep.subr.msk.mxu1 %vm61_vm0, %v47_v2  ;;  %v447_v7 = vld [vmem:[%s595_s0] sm:$0xff] }
   0x5   :  { %v29_v8 = vld [vmem:[%s596_s1 + $0x60] sm:$0xff] }
   0x7   :  { %298 = vmatpush3.xpose.msk.msra.mxu0 %vm61_vm0, %v31_v3  ;;  %348 = vmatpush3.xpose.msk.msra.mxu1 %vm61_vm0, %v31_v3 }
   0x8   :  { %299 = vmatprep.subr.msk.mxu0 %vm61_vm0, %v46_v4  ;;  %333 = vmatprep.subr.msk.mxu1 %vm61_vm0, %v46_v4 }
   0xb   :  { %300 = vmatpush3.xpose.msk.msra.mxu0 %vm61_vm0, %v30_v5  ;;  %349 = vmatpush3.xpose.msk.msra.mxu1 %vm61_vm0, %v30_v5 }
   0xc   :  { %301 = vmatprep.subr.msk.mxu0 %vm61_vm0, %v45_v6  ;;  %334 = vmatprep.subr.msk.mxu1 %vm61_vm0, %v45_v6 }
   0xd   :  { %8 = vsyncpa [#allocation3], 0  ;;  %v44_v10 = vld [vmem:[%s596_s1 + $0xd8] sm:$0xff]  ;;  %327 = vmatprep.mubr.msk.f32.mxu0 %vm61_vm0, %v447_v7  ;;  %329 = vmatprep.mubr.msk.f32.mxu1 %vm61_vm0, %v457_v9  ;;  %v43_v12 = vld [vmem:[%s596_s1 + $0xd0] sm:$0xff]  ;;  %v51_v34 = vlaneseq }
   0xe   :  { %v28_v11 = vld [vmem:[%s596_s1 + $0x58] sm:$0xff]  ;;  %v27_v13 = vld [vmem:[%s596_s1 + $0x50] sm:$0xff]  ;;  %v42_v14 = vld [vmem:[%s596_s1 + $0xc8] sm:$0xff] }
   0xf   :  { %302 = vmatpush3.xpose.msk.msra.mxu0 %vm61_vm0, %v29_v8  ;;  %350 = vmatpush3.xpose.msk.msra.mxu1 %vm61_vm0, %v29_v8  ;;  %v26_v15 = vld [vmem:[%s596_s1 + $0x48] sm:$0xff]  ;;  %v41_v16 = vld [vmem:[%s596_s1 + $0xc0] sm:$0xff]  ;;  %v40_v18 = vld [vmem:[%s596_s1 + $0xb8] sm:$0xff]  ;;  %v52_v35 = vshrl.u32 %v51_v34, 7 }
  0x10   :  { %303 = vmatprep.subr.msk.mxu0 %vm61_vm0, %v44_v10  ;;  %335 = vmatprep.subr.msk.mxu1 %vm61_vm0, %v44_v10  ;;  %v25_v17 = vld [vmem:[%s596_s1 + $0x40] sm:$0xff]  ;;  %v24_v19 = vld [vmem:[%s596_s1 + $0x38] sm:$0xff]  ;;  %v39_v20 = vld [vmem:[%s596_s1 + $0xb0] sm:$0xff] }
  0x11   :  { %v23_v21 = vld [vmem:[%s596_s1 + $0x30] sm:$0xff]  ;;  %v38_v22 = vld [vmem:[%s596_s1 + $0xa8] sm:$0xff]  ;;  %v37_v24 = vld [vmem:[%s596_s1 + $0xa0] sm:$0xff]  ;;  %v53_v36 = vsub.s32 0, %v52_v35  ;;  %v57_v38 = vsub.s32 1, %v52_v35 }
  0x12   :  { %v22_v23 = vld [vmem:[%s596_s1 + $0x28] sm:$0xff]  ;;  %v21_v25 = vld [vmem:[%s596_s1 + $0x20] sm:$0xff]  ;;  %v36_v26 = vld [vmem:[%s596_s1 + $0x98] sm:$0xff] }
  0x13   :  { %304 = vmatpush3.xpose.msk.msra.mxu0 %vm61_vm0, %v28_v11  ;;  %351 = vmatpush3.xpose.msk.msra.mxu1 %vm61_vm0, %v28_v11  ;;  %v20_v27 = vld [vmem:[%s596_s1 + $0x18] sm:$0xff]  ;;  %v35_v28 = vld [vmem:[%s596_s1 + $0x90] sm:$0xff]  ;;  %v34_v30 = vld [vmem:[%s596_s1 + $0x88] sm:$0xff] }
  0x14   :  { %305 = vmatprep.subr.msk.mxu0 %vm61_vm0, %v43_v12  ;;  %336 = vmatprep.subr.msk.mxu1 %vm61_vm0, %v43_v12  ;;  %v19_v29 = vld [vmem:[%s596_s1 + $0x10] sm:$0xff]  ;;  %v18_v31 = vld [vmem:[%s596_s1 + $0x8] sm:$0xff]  ;;  %v33_v32 = vld [vmem:[%s596_s1 + $0x80] sm:$0xff] }
  0x15   :  { %v17_v33 = vld [vmem:[%s596_s1] sm:$0xff]  ;;  %s388_s1 = smov [#allocation2]  }
  0x16   :  { %v49_v37 = vld [vmem:[%s597_s2] sm:$0x3]  ;;  %s250_s26 = sshll.u32 %s388_s1, 4  ;;  %s251_s26 = int_to_ptr.vmem [resolvable:$true] %s250_s26 }
  0x17   :  { %306 = vmatpush3.xpose.msk.msra.mxu0 %vm61_vm0, %v27_v13  ;;  %352 = vmatpush3.xpose.msk.msra.mxu1 %vm61_vm0, %v27_v13  ;;  %v54_v39 = vrot.slane %v49_v37, %v53_v36  ;;  %v58_v40 = vrot.slane %v49_v37, %v57_v38  ;;  %s366_s27 = scalar_lea.vmem %s251_s26, 512  ;;  %p371_p1 = scmp.lt.s32.totalorder %s251_s26, %s251_s26 }
  0x18   :  { %307 = vmatprep.subr.msk.mxu0 %vm61_vm0, %v42_v14  ;;  %337 = vmatprep.subr.msk.mxu1 %vm61_vm0, %v42_v14  ;;  %p367_p0 = scmp.ne.s32.totalorder %s251_s26, %s366_s27  ;;  %p372_p2 = scmp.lt.s32.totalorder %s366_s27, %s366_s27 }
  0x1a   :  { %p373_p3 = por %p372_p2, %p371_p1 }
  0x1b   :  { %308 = vmatpush3.xpose.msk.msra.mxu0 %vm61_vm0, %v26_v15  ;;  %353 = vmatpush3.xpose.msk.msra.mxu1 %vm61_vm0, %v26_v15 }
  0x1c   :  { %309 = vmatprep.subr.msk.mxu0 %vm61_vm0, %v41_v16  ;;  %338 = vmatprep.subr.msk.mxu1 %vm61_vm0, %v41_v16  ;;  %p374_p4 = pnand %p373_p3, %p367_p0 }
  0x1f   :  { %310 = vmatpush3.xpose.msk.msra.mxu0 %vm61_vm0, %v25_v17  ;;  %354 = vmatpush3.xpose.msk.msra.mxu1 %vm61_vm0, %v25_v17 }
  0x20   :  { %311 = vmatprep.subr.msk.mxu0 %vm61_vm0, %v40_v18  ;;  %339 = vmatprep.subr.msk.mxu1 %vm61_vm0, %v40_v18 }
  0x23   :  { %312 = vmatpush3.xpose.msk.msra.mxu0 %vm61_vm0, %v24_v19  ;;  %355 = vmatpush3.xpose.msk.msra.mxu1 %vm61_vm0, %v24_v19 }
  0x24   :  { %313 = vmatprep.subr.msk.mxu0 %vm61_vm0, %v39_v20  ;;  %340 = vmatprep.subr.msk.mxu1 %vm61_vm0, %v39_v20 }
  0x27   :  { %314 = vmatpush3.xpose.msk.msra.mxu0 %vm61_vm0, %v23_v21  ;;  %356 = vmatpush3.xpose.msk.msra.mxu1 %vm61_vm0, %v23_v21 }
  0x28   :  { %315 = vmatprep.subr.msk.mxu0 %vm61_vm0, %v38_v22  ;;  %341 = vmatprep.subr.msk.mxu1 %vm61_vm0, %v38_v22 }
  0x2b   :  { %316 = vmatpush3.xpose.msk.msra.mxu0 %vm61_vm0, %v22_v23  ;;  %357 = vmatpush3.xpose.msk.msra.mxu1 %vm61_vm0, %v22_v23 }
  0x2c   :  { %317 = vmatprep.subr.msk.mxu0 %vm61_vm0, %v37_v24  ;;  %342 = vmatprep.subr.msk.mxu1 %vm61_vm0, %v37_v24 }
  0x2f   :  { %318 = vmatpush3.xpose.msk.msra.mxu0 %vm61_vm0, %v21_v25  ;;  %358 = vmatpush3.xpose.msk.msra.mxu1 %vm61_vm0, %v21_v25 }
  0x30   :  { %319 = vmatprep.subr.msk.mxu0 %vm61_vm0, %v36_v26  ;;  %343 = vmatprep.subr.msk.mxu1 %vm61_vm0, %v36_v26 }
  0x33   :  { %320 = vmatpush3.xpose.msk.msra.mxu0 %vm61_vm0, %v20_v27  ;;  %359 = vmatpush3.xpose.msk.msra.mxu1 %vm61_vm0, %v20_v27 }
  0x34   :  { %321 = vmatprep.subr.msk.mxu0 %vm61_vm0, %v35_v28  ;;  %344 = vmatprep.subr.msk.mxu1 %vm61_vm0, %v35_v28 }
  0x37   :  { %322 = vmatpush3.xpose.msk.msra.mxu0 %vm61_vm0, %v19_v29  ;;  %360 = vmatpush3.xpose.msk.msra.mxu1 %vm61_vm0, %v19_v29 }
  0x38   :  { %323 = vmatprep.subr.msk.mxu0 %vm61_vm0, %v34_v30  ;;  %345 = vmatprep.subr.msk.mxu1 %vm61_vm0, %v34_v30 }
  0x3b   :  { %324 = vmatpush3.xpose.msk.msra.mxu0 %vm61_vm0, %v18_v31  ;;  %361 = vmatpush3.xpose.msk.msra.mxu1 %vm61_vm0, %v18_v31 }
  0x3c   :  { %325 = vmatprep.subr.msk.mxu0 %vm61_vm0, %v33_v32  ;;  %346 = vmatprep.subr.msk.mxu1 %vm61_vm0, %v33_v32 }
  0x3f   :  { %326 = vmatpush3.xpose.msk.msra.mxu0 %vm61_vm0, %v17_v33  ;;  %362 = vmatpush3.xpose.msk.msra.mxu1 %vm61_vm0, %v17_v33 }
  0x42   :  { %328 = vmatmul.mubr.msk.f32.vlgmr.msra.gmra.mxu0 %vm61_vm0, %v447_v7  ;;  %330 = vmatmul.mubr.msk.f32.vlgmr.msra.gmra.mxu1 %vm61_vm0, %v457_v9 }
 0x102   :  { %v230_v41 = vpop.f32.mrf.mxu0  ;;  %v236_v42 = vpop.f32.mrf.mxu1 }
 0x103   :  { %v231_v43 = vadd.f32 %v230_v41, %v54_v39  ;;  %v237_v44 = vadd.f32 %v236_v42, %v54_v39 }
 0x104   :  { %v232_v45 = vpop.f32.mrf.mxu0  ;;  %v238_v46 = vpop.f32.mrf.mxu1 }
 0x105   :  { %241 = vst [vmem:[#allocation2] sm:$0xff] %v231_v43  ;;  %243 = vst [vmem:[#allocation2 + $0x10] sm:$0xff] %v237_v44  ;;  %v233_v47 = vadd.f32 %v232_v45, %v58_v40  ;;  %v239_v48 = vadd.f32 %v238_v46, %v58_v40 }
 0x107   :  { %242 = vst [vmem:[#allocation2 + $0x8] sm:$0xff] %v233_v47  ;;  %244 = vst [vmem:[#allocation2 + $0x18] sm:$0xff] %v239_v48 }
 0x108   :  { %377 = shalt.err (!%p374_p4)
}
 0x109   :  { %s389_s2 = smov 256   ;;  %s390_s28 = smov 16  }
 0x10a   :  { %256 = dma.vmem_to_hbm [thread:$0]  %s251_s26, 512, %s598_s3, [#allocation3], %s389_s2, %s389_s2, %s390_s28  }
 0x10b   :  { %386 = dma.done.wait [#allocation3], 512  }
 0x10c   :  { %387 = vsyncadd [#allocation3], 4294966784 }
 0x10d   :  { %260 = vsyncpa [#allocation3], 1 }

</bundles_post_ra>
